<compile_context>
chip_gen: v7x
topology: tpu7x:2x2x1
jax: 0.10.0
libtpu: 0.0.40
codegen_flags: <defaults>
</compile_context>

<pallas_src>
import jax
import jax.numpy as jnp
from jax import lax
from jax.experimental import pallas as pl
from jax.experimental.pallas import tpu as pltpu

KSIZE = 3
PAD = (KSIZE - 1) // 2        # = 1 (reflect padding)
EPS = 1e-5                    # nn.BatchNorm1d default
NEG_SLOPE = 0.01              # nn.LeakyReLU default


# --------------------------- in-kernel helpers ------------------------------

def _boundary_masks(lh):
    pos = lax.broadcasted_iota(jnp.int32, (1, lh), 1)
    return pos == 0, pos == lh - 1


def _leaky_relu(v):
    return jnp.maximum(v, NEG_SLOPE * v)


def _tile_stats(v_f32, mean_ref, ssq_ref):
    """Per-tile centered BatchNorm stats; combined globally in the wrapper."""
    m = jnp.mean(v_f32, axis=1, keepdims=True)                 # (C, 1)
    d = v_f32 - m
    mean_ref[...] = m
    ssq_ref[...] = jnp.sum(d * d, axis=1, keepdims=True)       # centered SSQ


# ------------------------------- kernels -------------------------------------

def _conv_pool_stats_kernel(xe_ref, xo_ref, w1_ref, h_ref, mean_ref, ssq_ref):
    """Conv1d(k=3, reflect, no bias) fused with AvgPool1d(2) for one sample."""
    xe = xe_ref[...]                           # (Cin, lh) = x[:, 0::2]
    xo = xo_ref[...]                           # (Cin, lh) = x[:, 1::2]
    lh = xe.shape[1]
    is_first, is_last = _boundary_masks(lh)

    # Hoisted +/-1 shifts, reused by the reflect-boundary selects below.
    xo_m1 = jnp.roll(xo, 1, axis=1)            # xo[m-1] (wraps; fixed at m=0)
    xe_p1 = jnp.roll(xe, -1, axis=1)           # xe[m+1] (wraps; fixed at m=lh-1)

    # pooled[m] = 0.5*(conv[2m] + conv[2m+1])
    #           = 0.5*( W0@(x[2m-1]+x[2m]) + W1@(x[2m]+x[2m+1]) + W2@(x[2m+1]+x[2m+2]) )
    x_prev = jnp.where(is_first, xo, xo_m1)    # x[2m-1]; reflect x[-1] -> x[1]
    x_next = jnp.where(is_last, xe, xe_p1)     # x[2m+2]; reflect x[L]  -> x[L-2]
    t0 = x_prev + xe
    t1 = xe + xo
    t2 = xo + x_next

    # Three per-tap GEMMs accumulated in f32 (no sub-(8,128) im2col concat).
    h = jnp.dot(w1_ref[0], t0, preferred_element_type=jnp.float32)
    h = h + jnp.dot(w1_ref[1], t1, preferred_element_type=jnp.float32)
    h = h + jnp.dot(w1_ref[2], t2, preferred_element_type=jnp.float32)
    h = 0.5 * h                                # AvgPool1d(2)

    h_ref[...] = h.astype(h_ref.dtype)
    _tile_stats(h, mean_ref, ssq_ref)


def _bn_act_conv_stats_kernel(h_ref, sc_ref, sh_ref, w2_ref,
                              y_ref, mean_ref, ssq_ref):
    """BN1(affine=False) -> LeakyReLU -> Conv1d(k=3, reflect) for one sample."""
    h = h_ref[...].astype(jnp.float32)
    a = _leaky_relu(h * sc_ref[...] + sh_ref[...])   # hoisted BN scale/shift FMA
    a = a.astype(y_ref.dtype)                        # MXU operand dtype
    lh = a.shape[1]
    is_first, is_last = _boundary_masks(lh)

    a_m1 = jnp.roll(a, 1, axis=1)                    # a[m-1] (hoisted, reused)
    a_p1 = jnp.roll(a, -1, axis=1)                   # a[m+1] (hoisted, reused)
    left = jnp.where(is_first, a_p1, a_m1)           # reflect: a[-1]  -> a[1]
    right = jnp.where(is_last, a_m1, a_p1)           # reflect: a[lh]  -> a[lh-2]

    y = jnp.dot(w2_ref[0], left, preferred_element_type=jnp.float32)
    y = y + jnp.dot(w2_ref[1], a, preferred_element_type=jnp.float32)
    y = y + jnp.dot(w2_ref[2], right, preferred_element_type=jnp.float32)

    y_ref[...] = y.astype(y_ref.dtype)
    _tile_stats(y, mean_ref, ssq_ref)


def _bn_act_kernel(y_ref, sc_ref, sh_ref, o_ref):
    """BN2(affine=False) -> LeakyReLU, writes the final (Cout, L//2) slab."""
    y = y_ref[...].astype(jnp.float32)
    o_ref[...] = _leaky_relu(y * sc_ref[...] + sh_ref[...]).astype(o_ref.dtype)


# --------------------------- wrapper-side helpers -----------------------------

def _bn_scale_shift(tile_mean, tile_ssq, tile_count):
    """Combine per-tile centered stats (Chan et al.) into BN scale/shift.

    tile_mean / tile_ssq: (T, C, 1) f32.  Tiny arrays -> plain XLA ops.
    """
    total = tile_mean.shape[0] * tile_count
    mean = jnp.mean(tile_mean, axis=0)                                   # (C, 1)
    var = (jnp.sum(tile_ssq, axis=0)
           + tile_count * jnp.sum((tile_mean - mean) ** 2, axis=0)) / total
    scale = lax.rsqrt(var + EPS)
    shift = -mean * scale
    return scale, shift


def down_forward(x, w1, w2):
    """x: (N, Cin, L); w1: (Cout, Cin, K); w2: (Cout, Cout, K).
    Returns (N, Cout, L//2), matching the PyTorch `Down` module (training-mode
    BatchNorm, affine=False, LeakyReLU(0.01)).  Dtype-preserving: pass bf16
    x / weights to halve DMA bytes and feed the MXU at its bf16 rate."""
    n, cin, l = x.shape
    cout = w1.shape[0]
    assert w1.shape == (cout, cin, KSIZE) and w2.shape == (cout, cout, KSIZE)
    assert l % 2 == 0, "AvgPool1d(2) path assumes even length"
    lh = l // 2
    assert lh >= 2, "reflect padding after pooling needs L//2 >= 2"
    dt = x.dtype

    # Even/odd deinterleave along the last axis only; batch/channel layout
    # stays native NCL (no XLA-side transposes of activations).
    xe = x[:, :, 0::2]                                     # (N, Cin, lh)
    xo = x[:, :, 1::2]                                     # (N, Cin, lh)

    # Per-tap weight matrices (K, Cout, Cin): the kernel does three aligned
    # GEMMs instead of building a sub-(8,128) im2col concatenate.  Tiny.
    w1_t = jnp.transpose(w1, (2, 0, 1)).astype(dt)         # (K, Cout, Cin)
    w2_t = jnp.transpose(w2, (2, 0, 1)).astype(dt)         # (K, Cout, Cout)

    # Explicit VMEM budget with headroom for v7x (64 MiB / TC); batch axis is
    # 'parallel' (no cross-step state), so v7x's two TensorCores split it.
    cparams = pltpu.CompilerParams(
        dimension_semantics=("parallel",),
        vmem_limit_bytes=48 * 1024 * 1024,
    )

    def slab_spec(c):        # one (c, lh) sample slab, batch dim squeezed
        return pl.BlockSpec((None, c, lh), lambda b: (b, 0, 0))

    def bcast_spec(shape):   # whole (small) array, same block every grid step
        return pl.BlockSpec(shape, lambda b: (0,) * len(shape))

    stat_spec = pl.BlockSpec((None, cout, 1), lambda b: (b, 0, 0))
    stat_shape = jax.ShapeDtypeStruct((n, cout, 1), jnp.float32)

    # ---- pass 1: Conv1d fused with AvgPool1d(2) + per-sample BN stats -------
    h, m1, ssq1 = pl.pallas_call(
        _conv_pool_stats_kernel,
        grid=(n,),
        in_specs=[slab_spec(cin), slab_spec(cin), bcast_spec((KSIZE, cout, cin))],
        out_specs=(slab_spec(cout), stat_spec, stat_spec),
        out_shape=(jax.ShapeDtypeStruct((n, cout, lh), dt), stat_shape, stat_shape),
        compiler_params=cparams,
    )(xe, xo, w1_t)
    scale1, shift1 = _bn_scale_shift(m1, ssq1, lh)

    # ---- pass 2: BN1 + LeakyReLU + Conv1d + per-sample BN stats --------------
    y, m2, ssq2 = pl.pallas_call(
        _bn_act_conv_stats_kernel,
        grid=(n,),
        in_specs=[slab_spec(cout), bcast_spec((cout, 1)), bcast_spec((cout, 1)),
                  bcast_spec((KSIZE, cout, cout))],
        out_specs=(slab_spec(cout), stat_spec, stat_spec),
        out_shape=(jax.ShapeDtypeStruct((n, cout, lh), dt), stat_shape, stat_shape),
        compiler_params=cparams,
    )(h, scale1, shift1, w2_t)
    scale2, shift2 = _bn_scale_shift(m2, ssq2, lh)

    # ---- pass 3: BN2 + LeakyReLU, result written directly as (N, Cout, lh) ---
    out = pl.pallas_call(
        _bn_act_kernel,
        grid=(n,),
        in_specs=[slab_spec(cout), bcast_spec((cout, 1)), bcast_spec((cout, 1))],
        out_specs=slab_spec(cout),
        out_shape=jax.ShapeDtypeStruct((n, cout, lh), dt),
        compiler_params=cparams,
    )(y, scale2, shift2)
    return out


# --------------------------- pure-JAX reference ------------------------------

def down_reference(x, w1, w2):
    def conv(a, w):                     # a: (N,C,L), w: (O,C,K), reflect pad 1
        ap = jnp.pad(a, ((0, 0), (0, 0), (PAD, PAD)), mode="reflect")
        l = a.shape[-1]
        return sum(jnp.einsum("ncl,oc->nol", ap[:, :, k:k + l], w[:, :, k])
                   for k in range(KSIZE))

    def bn(a):
        m = a.mean(axis=(0, 2), keepdims=True)
        v = ((a - m) ** 2).mean(axis=(0, 2), keepdims=True)
        return (a - m) / jnp.sqrt(v + EPS)

    def lrelu(a):
        return jnp.where(a >= 0, a, NEG_SLOPE * a)

    h = conv(x, w1)
    h = 0.5 * (h[:, :, 0::2] + h[:, :, 1::2])   # AvgPool1d(2)
    h = lrelu(bn(h))
    h = conv(h, w2)
    h = lrelu(bn(h))
    return h


# --------------------------------- main --------------------------------------

if __name__ == "__main__":
    key = jax.random.PRNGKey(0)
    k1, k2, k3 = jax.random.split(key, 3)

    N, CIN, COUT, L = 2, 4, 8, 16
    x = jax.random.normal(k1, (N, CIN, L), jnp.float32)

    # Deterministic, PyTorch-convention (Cout, Cin, K) weights.
    b1 = 1.0 / (CIN * KSIZE) ** 0.5
    w1 = jax.random.uniform(k2, (COUT, CIN, KSIZE), jnp.float32, -b1, b1)
    b2 = 1.0 / (COUT * KSIZE) ** 0.5
    w2 = jax.random.uniform(k3, (COUT, COUT, KSIZE), jnp.float32, -b2, b2)

    out = down_forward(x, w1, w2)
    jax.block_until_ready(out)

    assert out.shape == (N, COUT, L // 2), out.shape
    ref = down_reference(x, w1, w2)
    assert jnp.allclose(out, ref, rtol=1e-4, atol=1e-4), float(
        jnp.max(jnp.abs(out - ref)))

    print("KERNEL_OK")
</pallas_src>

<mosaic_0001>
module attributes {stable_mosaic.version = 11 : i64} {
  func.func @_conv_pool_stats_kernel(%arg0: i32, %arg1: memref<1x4x8xf32, #tpu.memory_space<vmem>>, %arg2: memref<1x4x8xf32, #tpu.memory_space<vmem>>, %arg3: memref<3x8x4xf32, #tpu.memory_space<vmem>>, %arg4: memref<1x8x8xf32, #tpu.memory_space<vmem>>, %arg5: memref<1x8x1xf32, #tpu.memory_space<vmem>>, %arg6: memref<1x8x1xf32, #tpu.memory_space<vmem>>) attributes {dimension_semantics = [#tpu.dimension_semantics<parallel>], iteration_bounds = array<i64: 2>, scalar_prefetch = 0 : i64, scratch_operands = 0 : i64, tpu.core_type = #tpu.core_type<tc>, window_params = [{transform_indices = @transform_0, window_bounds = array<i64: 1, 4, 8>}, {transform_indices = @transform_1, window_bounds = array<i64: 1, 4, 8>}, {pipeline_mode = #tpu.pipeline_mode<synchronous>, transform_indices = @transform_2, window_bounds = array<i64: 3, 8, 4>}, {transform_indices = @transform_3, window_bounds = array<i64: 1, 8, 8>}, {transform_indices = @transform_4, window_bounds = array<i64: 1, 8, 1>}, {transform_indices = @transform_5, window_bounds = array<i64: 1, 8, 1>}]} {
    %c0 = arith.constant 0 : index
    %c0_0 = arith.constant 0 : index
    %c0_1 = arith.constant 0 : index
    %0 = vector.load %arg1[%c0, %c0_0, %c0_1] : memref<1x4x8xf32, #tpu.memory_space<vmem>>, vector<1x4x8xf32>
    %1 = vector.shape_cast %0 : vector<1x4x8xf32> to vector<4x8xf32>
    %c0_2 = arith.constant 0 : index
    %c0_3 = arith.constant 0 : index
    %c0_4 = arith.constant 0 : index
    %2 = vector.load %arg2[%c0_2, %c0_3, %c0_4] : memref<1x4x8xf32, #tpu.memory_space<vmem>>, vector<1x4x8xf32>
    %3 = vector.shape_cast %2 : vector<1x4x8xf32> to vector<4x8xf32>
    %4 = tpu.iota {dimensions = array<i32: 1>} : vector<1x8xi32>
    %c0_i32 = arith.constant 0 : i32
    %5 = vector.broadcast %c0_i32 : i32 to vector<1x8xi32>
    %6 = arith.cmpi eq, %4, %5 : vector<1x8xi32>
    %c7_i32 = arith.constant 7 : i32
    %7 = vector.broadcast %c7_i32 : i32 to vector<1x8xi32>
    %8 = arith.cmpi eq, %4, %7 : vector<1x8xi32>
    %9 = vector.extract_strided_slice %3 {offsets = [0, 7], sizes = [4, 1], strides = [1, 1]} : vector<4x8xf32> to vector<4x1xf32>
    %10 = vector.extract_strided_slice %3 {offsets = [0, 0], sizes = [4, 7], strides = [1, 1]} : vector<4x8xf32> to vector<4x7xf32>
    %11 = tpu.concatenate %9, %10 in 1 : vector<4x1xf32>, vector<4x7xf32> -> vector<4x8xf32>
    %12 = vector.extract_strided_slice %1 {offsets = [0, 1], sizes = [4, 7], strides = [1, 1]} : vector<4x8xf32> to vector<4x7xf32>
    %13 = vector.extract_strided_slice %1 {offsets = [0, 0], sizes = [4, 1], strides = [1, 1]} : vector<4x8xf32> to vector<4x1xf32>
    %14 = tpu.concatenate %12, %13 in 1 : vector<4x7xf32>, vector<4x1xf32> -> vector<4x8xf32>
    %15 = vector.shape_cast %6 : vector<1x8xi1> to vector<1x8xi1>
    %16 = vector.broadcast %15 : vector<1x8xi1> to vector<4x8xi1>
    %17 = arith.select %16, %3, %11 : vector<4x8xi1>, vector<4x8xf32>
    %18 = vector.shape_cast %8 : vector<1x8xi1> to vector<1x8xi1>
    %19 = vector.broadcast %18 : vector<1x8xi1> to vector<4x8xi1>
    %20 = arith.select %19, %1, %14 : vector<4x8xi1>, vector<4x8xf32>
    %21 = arith.addf %17, %1 : vector<4x8xf32>
    %22 = arith.addf %1, %3 : vector<4x8xf32>
    %23 = arith.addf %3, %20 : vector<4x8xf32>
    %c0_5 = arith.constant 0 : index
    %c0_6 = arith.constant 0 : index
    %c0_7 = arith.constant 0 : index
    %24 = vector.load %arg3[%c0_5, %c0_6, %c0_7] : memref<3x8x4xf32, #tpu.memory_space<vmem>>, vector<1x8x4xf32>
    %25 = vector.shape_cast %24 : vector<1x8x4xf32> to vector<8x4xf32>
    %cst = arith.constant dense<0.000000e+00> : vector<8x8xf32>
    %26 = tpu.matmul %25, %21, %cst {dimension_numbers = #tpu.dot_dimension_numbers<[1], [0], [0], [1], [0, 0, 1, 1], [], []>} : vector<8x4xf32>, vector<4x8xf32>, vector<8x8xf32> -> vector<8x8xf32>
    %c1 = arith.constant 1 : index
    %c0_8 = arith.constant 0 : index
    %c0_9 = arith.constant 0 : index
    %27 = vector.load %arg3[%c1, %c0_8, %c0_9] : memref<3x8x4xf32, #tpu.memory_space<vmem>>, vector<1x8x4xf32>
    %28 = vector.shape_cast %27 : vector<1x8x4xf32> to vector<8x4xf32>
    %cst_10 = arith.constant dense<0.000000e+00> : vector<8x8xf32>
    %29 = tpu.matmul %28, %22, %cst_10 {dimension_numbers = #tpu.dot_dimension_numbers<[1], [0], [0], [1], [0, 0, 1, 1], [], []>} : vector<8x4xf32>, vector<4x8xf32>, vector<8x8xf32> -> vector<8x8xf32>
    %30 = arith.addf %26, %29 : vector<8x8xf32>
    %c2 = arith.constant 2 : index
    %c0_11 = arith.constant 0 : index
    %c0_12 = arith.constant 0 : index
    %31 = vector.load %arg3[%c2, %c0_11, %c0_12] : memref<3x8x4xf32, #tpu.memory_space<vmem>>, vector<1x8x4xf32>
    %32 = vector.shape_cast %31 : vector<1x8x4xf32> to vector<8x4xf32>
    %cst_13 = arith.constant dense<0.000000e+00> : vector<8x8xf32>
    %33 = tpu.matmul %32, %23, %cst_13 {dimension_numbers = #tpu.dot_dimension_numbers<[1], [0], [0], [1], [0, 0, 1, 1], [], []>} : vector<8x4xf32>, vector<4x8xf32>, vector<8x8xf32> -> vector<8x8xf32>
    %34 = arith.addf %30, %33 : vector<8x8xf32>
    %cst_14 = arith.constant 5.000000e-01 : f32
    %35 = vector.broadcast %cst_14 : f32 to vector<8x8xf32>
    %36 = arith.mulf %35, %34 : vector<8x8xf32>
    %c0_15 = arith.constant 0 : index
    %c0_16 = arith.constant 0 : index
    %c0_17 = arith.constant 0 : index
    %37 = vector.load %arg4[%c0_15, %c0_16, %c0_17] : memref<1x8x8xf32, #tpu.memory_space<vmem>>, vector<1x8x8xf32>
    %38 = vector.shape_cast %37 : vector<1x8x8xf32> to vector<8x8xf32>
    %39 = vector.shape_cast %36 : vector<8x8xf32> to vector<1x8x8xf32>
    tpu.vector_store %arg4[%c0_15, %c0_16, %c0_17], %39 {strides = array<i32>} : memref<1x8x8xf32, #tpu.memory_space<vmem>>, vector<1x8x8xf32>,
    %cst_18 = arith.constant dense<0.000000e+00> : vector<8xf32>
    %40 = vector.multi_reduction <add>, %36, %cst_18 [1] : vector<8x8xf32> to vector<8xf32>
    %41 = vector.shape_cast %40 : vector<8xf32> to vector<8x1xf32>
    %cst_19 = arith.constant 8.000000e+00 : f32
    %42 = vector.broadcast %cst_19 : f32 to vector<8x1xf32>
    %43 = arith.divf %41, %42 : vector<8x1xf32>
    %44 = vector.broadcast %43 : vector<8x1xf32> to vector<8x8xf32>
    %45 = arith.subf %36, %44 : vector<8x8xf32>
    %c0_20 = arith.constant 0 : index
    %c0_21 = arith.constant 0 : index
    %c0_22 = arith.constant 0 : index
    %46 = vector.load %arg5[%c0_20, %c0_21, %c0_22] : memref<1x8x1xf32, #tpu.memory_space<vmem>>, vector<1x8x1xf32>
    %47 = vector.shape_cast %46 : vector<1x8x1xf32> to vector<8x1xf32>
    %48 = vector.shape_cast %43 : vector<8x1xf32> to vector<1x8x1xf32>
    tpu.vector_store %arg5[%c0_20, %c0_21, %c0_22], %48 {strides = array<i32>} : memref<1x8x1xf32, #tpu.memory_space<vmem>>, vector<1x8x1xf32>,
    %49 = arith.mulf %45, %45 : vector<8x8xf32>
    %cst_23 = arith.constant dense<0.000000e+00> : vector<8xf32>
    %50 = vector.multi_reduction <add>, %49, %cst_23 [1] : vector<8x8xf32> to vector<8xf32>
    %51 = vector.shape_cast %50 : vector<8xf32> to vector<8x1xf32>
    %c0_24 = arith.constant 0 : index
    %c0_25 = arith.constant 0 : index
    %c0_26 = arith.constant 0 : index
    %52 = vector.load %arg6[%c0_24, %c0_25, %c0_26] : memref<1x8x1xf32, #tpu.memory_space<vmem>>, vector<1x8x1xf32>
    %53 = vector.shape_cast %52 : vector<1x8x1xf32> to vector<8x1xf32>
    %54 = vector.shape_cast %51 : vector<8x1xf32> to vector<1x8x1xf32>
    tpu.vector_store %arg6[%c0_24, %c0_25, %c0_26], %54 {strides = array<i32>} : memref<1x8x1xf32, #tpu.memory_space<vmem>>, vector<1x8x1xf32>,
    return
  }
  func.func @transform_0(%arg0: i32) -> (i32, i32, i32) {
    %c0_i32 = arith.constant 0 : i32
    %c0_i32_0 = arith.constant 0 : i32
    %c0_i32_1 = arith.constant 0 : i32
    return %arg0, %c0_i32, %c0_i32_0 : i32, i32, i32
  }
  func.func @transform_1(%arg0: i32) -> (i32, i32, i32) {
    %c0_i32 = arith.constant 0 : i32
    %c0_i32_0 = arith.constant 0 : i32
    %c0_i32_1 = arith.constant 0 : i32
    return %arg0, %c0_i32, %c0_i32_0 : i32, i32, i32
  }
  func.func @transform_2(%arg0: i32) -> (i32, i32, i32) {
    %c0_i32 = arith.constant 0 : i32
    %c0_i32_0 = arith.constant 0 : i32
    %c0_i32_1 = arith.constant 0 : i32
    %c0_i32_2 = arith.constant 0 : i32
    return %c0_i32, %c0_i32_0, %c0_i32_1 : i32, i32, i32
  }
  func.func @transform_3(%arg0: i32) -> (i32, i32, i32) {
    %c0_i32 = arith.constant 0 : i32
    %c0_i32_0 = arith.constant 0 : i32
    %c0_i32_1 = arith.constant 0 : i32
    return %arg0, %c0_i32, %c0_i32_0 : i32, i32, i32
  }
  func.func @transform_4(%arg0: i32) -> (i32, i32, i32) {
    %c0_i32 = arith.constant 0 : i32
    %c0_i32_0 = arith.constant 0 : i32
    %c0_i32_1 = arith.constant 0 : i32
    return %arg0, %c0_i32, %c0_i32_0 : i32, i32, i32
  }
  func.func @transform_5(%arg0: i32) -> (i32, i32, i32) {
    %c0_i32 = arith.constant 0 : i32
    %c0_i32_0 = arith.constant 0 : i32
    %c0_i32_1 = arith.constant 0 : i32
    return %arg0, %c0_i32, %c0_i32_0 : i32, i32, i32
  }
}

</mosaic_0001>

<bundles_post_ra>
// kernel: tpu_custom_call.1
= control target key start
LH: loop header
LB: loop body
LE: loop exit
PB: predicated region body
PF: predicated region fallthrough
CT: control target
= control target key end

     0   :  { %11 = vsyncpa [#allocation3], 0  ;;  %s1012_s0 = inlined_call_operand.vmem [shape: f32[2,4,8], index: 0, kind: input, shape index: {}]   ;;  %s1013_s1 = inlined_call_operand.vmem [shape: f32[2,4,8], index: 1, kind: input, shape index: {}]   ;;  %s1014_s2 = inlined_call_operand.vmem [shape: f32[3,8,4], index: 2, kind: input, shape index: {}]   ;;  %s1015_s3 = inlined_call_operand.hbm [shape: f32[2,8,8], index: 3, kind: output, shape index: {0}]   ;;  %s1016_s4 = inlined_call_operand.vmem [shape: f32[2,8,1], index: 4, kind: output, shape index: {1}]   ;;  %s1017_s5 = inlined_call_operand.vmem [shape: f32[2,8,1], index: 5, kind: output, shape index: {2}]  }
   0x1   :  { %13 = vsyncpa [#allocation3 + $0x1], 0  ;;  %s880_s18 = smov 0   ;;  %s882_s19 = smov 0  }
   0x2   :  { %s884_s20 = smov 0   ;;  %s886_s21 = smov 0  }
   0x3 LB: > { %s901_s22 = sadd.s32 4294967295, %s841_s21   ;;  %s689_s23 = sadd.s32 4294967294, %s841_s21   ;;  %s841_s21 = sphi %s886_s21, %s1023_s21   ;;  %s837_s20 = sphi %s884_s20, %s1022_s20   ;;  %s833_s19 = sphi %s882_s19, %s1021_s19   ;;  %s829_s18 = sphi %s880_s18, %s1020_s18  }
   0x4   : > { %s905_s24 = sadd.s32 1, %s841_s21   ;;  %s99_s25 = sadd.s32 1, %s837_s20 }
   0x5   : > { %s96_s26 = ssub.s32 %s841_s21, %s905_s24  ;;  %p109_p0 = scmp.ne.s32.totalorder %s837_s20, %s833_s19 }
   0x6   : > { %p97_p1 = scmp.eq.s32.totalorder %s96_s26, 0  ;;  %p110_p2 = scmp.eq.s32.totalorder %s901_s22, 1 }
   0x7   : > { %p115_p3 = scmp.ne.s32.totalorder %s833_s19, %s829_s18  ;;  %p116_p4 = scmp.eq.s32.totalorder %s689_s23, 1 }
   0x8   : > { %s916_s27 = scalar_select %p97_p1, %s837_s20, %s99_s25  }
   0x9   : > { %p918_p5 = por %p110_p2, %p109_p0  ;;  %p922_p6 = por %p116_p4, %p115_p3 }
   0xa   : > { %p692_p7 = scmp.ge.s32.totalorder %s841_s21, 1  ;;  %p203_p8 = scmp.lt.s32.totalorder %s841_s21, 3 }
   0xc   : > { %p204_p9 = pnand %p692_p7, %p203_p8 }
   0xd   : > { %p242_p10 = scmp.lt.s32.totalorder (!%p204_p9), %s901_s22, 1  ;;  %v843_v0 = vmov (!%p204_p9), 0.0   ;;  %vm844_vm0 = vmmov (!%p204_p9), 0   ;;  %s845_s13 = smov (!%p204_p9), 121   ;;  %v698_v4 = vld [vmem:[%s1014_s2 + $0x8] sm:$0xff] (!%p204_p9)  ;;  %vm298_vm1 = vcmask (!%p204_p9), 1043456   ;;  %v260_v5 = vlaneseq (!%p204_p9) }
   0xe   : > { %207 = sbr.rel (%p204_p9) target bundleno = 667 (0x29b), region = 32  ;;  %721 = vmatprep.subr.mxu0 (!%p204_p9), %v843_v0  ;;  %716 = vmatprep.subr.mxu1 (!%p204_p9), %v843_v0  ;;  %s846_s14 = smov (!%p204_p9), 127   ;;  %vm294_vm2 = vcmask (!%p204_p9), 31744   ;;  %vm271_vm3 = vcmask (!%p204_p9), 7168   ;;  %vm280_vm4 = vcmask (!%p204_p9), 56320   ;;  %v291_v17 = vld [vmem:[%s1014_s2] sm:$0xff] (!%p204_p9) }
   0xf   : > { %723 = vmatprep.mubr.msk.f32.mxu0 (!%p204_p9), %vm844_vm0, %v843_v0  ;;  %718 = vmatprep.mubr.msk.f32.mxu1 (!%p204_p9), %vm844_vm0, %v843_v0  ;;  %s847_s17 = smov (!%p204_p9), 1   ;;  %s848_s23 = smov (!%p204_p9), 7   ;;  %v261_v6 = vand.u32 (!%p204_p9), 127, %v260_v5  ;;  %v703_v18 = vld [vmem:[%s1014_s2 + $0x10] sm:$0xff] (!%p204_p9)  ;;  %vm528_vm7 = vcmask (!%p204_p9), 64512  }
  0x10   : > { %s227_s8 = sand.u32 (!%p204_p9), 1, %s833_s19   ;;  %s707_s15 = sshll.u32 (!%p204_p9), %s901_s22, 7 }
  0x11   : > { %vm262_vm5 = vcmp.eq.s32.totalorder (!%p204_p9), %v261_v6, 0  ;;  %vm263_vm6 = vcmp.eq.s32.totalorder (!%p204_p9), %v261_v6, 7  ;;  %s970_s25 = scalar_lea.hbm (!%p204_p9), %s1015_s3, %s707_s15  ;;  %s543_s26 = scalar_lea.sflag (!%p204_p9), [#allocation3], %s227_s8 }
  0x12   : > { %s849_s7 = smov (!%p204_p9), [#allocation2]  }
  0x15   : > { %s930_s30 = scalar_select %p242_p10, %s901_s22, 1 }
  0x17   : > { %s694_s6 = sshll.u32 %s930_s30, 2  ;;  %s696_s11 = sshll.u32 %s930_s30, 3 }
  0x18   : > { %s249_s9 = scalar_lea.vmem %s1013_s1, %s694_s6  ;;  %s245_s12 = scalar_lea.vmem %s1012_s0, %s694_s6 }
  0x19   : > { %v259_v1 = vld [vmem:[%s249_s9] sm:$0xf]  ;;  %s693_s9 = sshll.u32 %s227_s8, 3 }
  0x1a   : > { %v258_v2 = vld [vmem:[%s245_s12] sm:$0xf]  ;;  %265 = vrot.lane.b32.xlu0 %v259_v1, %s845_s13  ;;  %s229_s10 = scalar_lea.vmem [#allocation2], %s693_s9  ;;  %s783_s9 = sshll.u32 %s849_s7, 4  ;;  %s784_s9 = int_to_ptr.vmem [resolvable:$false] %s783_s9 }
  0x1b   : > { %274 = vrot.lane.b32.xlu1 %v258_v2, %s846_s14  ;;  %v289_v3 = vadd.f32 %v259_v1, %v258_v2  ;;  %s253_s14 = scalar_lea.vmem %s1016_s4, %s696_s11  ;;  %s564_s16 = sshll.u32 %s229_s10, 4  ;;  %s565_s16 = int_to_ptr.vmem [resolvable:$true] %s564_s16 }
  0x1c   : > { %s779_s6 = scalar_lea.vmem %s565_s16, 128  ;;  %s785_s12 = scalar_lea.vmem %s784_s9, 256 }
  0x1d   : > { %717 = vmatpush3.msk.msra.mxu1 %vm298_vm1, %v289_v3  ;;  %p780_p11 = scmp.ne.s32.totalorder %s565_s16, %s779_s6  ;;  %p786_p0 = scmp.lt.s32.totalorder %s565_s16, %s784_s9 }
  0x1e   : > { %719 = vmatmul.mubr.msk.f32.vlgmr.msra.gmra.mrb[0].mxu1 %vm294_vm2, %v698_v4  ;;  %268 = vrot.lane.b32.xlu0 %v259_v1, %s847_s17  ;;  %p787_p1 = scmp.lt.s32.totalorder %s785_s12, %s779_s6 }
  0x1f   : > { %277 = vrot.lane.b32.xlu1 %v258_v2, %s848_s23  ;;  %p781_p12 = pnand %p780_p11, %p918_p5 }
  0x20   : > { %p788_p2 = por %p787_p1, %p786_p0 }
  0x21   : > { %p782_p13 = pneg %p781_p12 }
  0x23   : > { %p789_p3 = pnand %p788_p2, %p782_p13 }
  0x8c   : > { %v266_v7 = vpop.permute.xlu0 %265 }
  0x8d   : > { %v275_v8 = vpop.permute.xlu1 %274 }
  0x90   : > { %v269_v9 = vpop.permute.xlu0 %268 }
  0x91   : > { %v278_v10 = vpop.permute.xlu1 %277  ;;  %v272_v11 = vsel %vm271_vm3, %v266_v7, %v269_v9 }
  0x92   : > { %v281_v12 = vsel %vm280_vm4, %v275_v8, %v278_v10  ;;  %v284_v13 = vsel %vm262_vm5, %v259_v1, %v272_v11 }
  0x93   : > { %v287_v14 = vsel %vm263_vm6, %v258_v2, %v281_v12  ;;  %v288_v16 = vadd.f32 %v284_v13, %v258_v2 }
  0x94   : > { %v290_v15 = vadd.f32 %v287_v14, %v259_v1 }
  0x95   : > { %722 = vmatpush3.msk.msra.mxu0 %vm298_vm1, %v288_v16 }
  0x96   : > { %724 = vmatmul.mubr.msk.f32.vlgmr.msra.gmra.mrb[0].mxu0 %vm294_vm2, %v291_v17  ;;  %726 = vmatprep.subr.mxu0 %v843_v0 }
  0x97   : > { %727 = vmatpush3.msk.msra.mxu0 %vm298_vm1, %v290_v15  ;;  %728 = vmatprep.mubr.msk.f32.mxu0 %vm844_vm0, %v843_v0 }
  0x9e   : > { %729 = vmatmul.mubr.msk.f32.vlgmr.msra.gmra.mrb[0].mxu0 %vm294_vm2, %v703_v18 }
  0xf1   : > { %v368_v19 = vpop.f32.mrb[0].mxu1 }
  0xf2   : > { %v720_v20 = vpop.f32.mrb[1].mxu1 }
 0x171   : > { %v522_v21 = vpop.f32.mrb[0].mxu0 }
 0x172   : > { %v731_v22 = vadd.f32 %v522_v21, %v368_v19  ;;  %v730_v23 = vpop.f32.mrb[1].mxu0 }
 0x174   : > { %v527_v24 = vmul.f32 0.5, %v731_v22 }
 0x176   : > { %v530_v25 = vsel %vm528_vm7, %v527_v24, 0.0  ;;  %529 = vst.msk [vmem:[%s229_s10] sm:$0xff] %vm528_vm7, %v527_v24 }
 0x177   : > { %531 = vadd.xlane.f32.xlu0 %v530_v25 }
 0x204   : > { %v532_v26 = vpop.xlane.xlu0 %531 }
 0x205   : > { %v534_v27 = vmul.f32 0.125, %v532_v26 }
 0x207   : > { %v535_v28 = vsub.f32 %v527_v24, %v534_v27  ;;  %536 = vst.msk [vmem:[%s253_s14] sm:$0xff] %vm271_vm3, %v534_v27 }
 0x209   : > { %v537_v29 = vmul.f32 %v535_v28, %v535_v28 }
 0x20b   : > { %v538_v30 = vsel %vm528_vm7, %v537_v29, 0.0 }
 0x20c   : > { %539 = vadd.xlane.f32.xlu1 %v538_v30 }
 0x20d   : > { %792 = shalt.err (!%p789_p3)
}
 0x20e   : > { %s793_s22 = scalar_lea.hbm %s970_s25, 128  ;;  %s797_s13 = scalar_lea.hbm %s1015_s3, 256 }
 0x20f   : > { %p794_p4 = scmp.ne.s32.totalorder %s970_s25, %s793_s22  ;;  %p798_p9 = scmp.lt.u32.totalorder %s970_s25, %s1015_s3 }
 0x210   : > { %p799_p10 = scmp.lt.u32.totalorder %s797_s13, %s793_s22  ;;  %p801_p12 = scmp.lt.u32.totalorder %s793_s22, %s970_s25 }
 0x211   : > { %p795_p7 = pnand %p794_p4, %p918_p5 }
 0x212   : > { %p800_p11 = por %p799_p10, %p798_p9 }
 0x213   : > { %p796_p8 = pneg %p795_p7 }
 0x214   : > { %p802_p13 = por %p801_p12, %p800_p11 }
 0x216   : > { %p803_p0 = pnand %p802_p13, %p796_p8 }
 0x218   : > { %806 = shalt.err (!%p803_p0)
}
 0x219   : > { %734 = dma.vmem_to_hbm [thread:$0]  (%p918_p5), %s565_s16, 128, %s970_s25, %s543_s26  }
 0x21a   : > { %s257_s6 = scalar_lea.vmem %s1017_s5, %s696_s11 }
 0x299   : > { %v540_v31 = vpop.xlane.xlu1 %539 }
 0x29a   : > { %541 = vst.msk [vmem:[%s257_s6] sm:$0xff] %vm271_vm3, %v540_v31 }
 0x29b PF: > { %p740_p1 = scmp.ge.s32.totalorder %s841_s21, 2  ;;  %s582_s7 = sand.u32 1, %s829_s18  }
 0x29c   : > { %s583_s28 = scalar_lea.sflag [#allocation3], %s582_s7 }
 0x29d   : > { %p737_p2 = pnand %p740_p1, %p922_p6 }
 0x29f   : > { %824 = dma.done.wait (!%p737_p2), %s583_s28, 128  }
 0x2a0   : > { %826 = vsyncadd (!%p737_p2), %s583_s28, 4294967168  ;;  %p16_p5 = scmp.ge.s32.totalorder %s905_s24, 4   ;;  %s1020_s18 = smov %s833_s19 }
 0x2a1   : > { %s1021_s19 = smov %s837_s20  ;;  %s1022_s20 = smov %s916_s27 }
 0x2a2   : > { %s1023_s21 = smov %s905_s24  ;;  %18 = sbr.rel (!%p16_p5) target bundleno = 3 (0x3), region = 96 }
 0x2a9   :  { %602 = vsyncpa [#allocation3], 1 }
 0x2aa   :  { %604 = vsyncpa [#allocation3 + $0x1], 1 }

</bundles_post_ra>
